<compile_context>
chip_gen: v7x
topology: tpu7x:2x2x1
jax: 0.10.0
libtpu: 0.0.40
codegen_flags: <defaults>
</compile_context>

<pallas_src>
import jax
import jax.numpy as jnp
import numpy as np
from jax.experimental import pallas as pl
from jax.experimental.pallas import tpu as pltpu


def _alignment_kernel(src_ref, tgt_ref, wm_ref, bm_ref, wo_ref, bo_ref,
                      val_ref, attn_ref):
    # src_ref : (BB, D, H) bf16   source embeddings for this batch block
    # tgt_ref : (BB, T)    i32    target tokens for this batch block
    # wm_ref  : (H, H)     bf16   mapping weight, pre-transposed to [in, out]
    # bm_ref  : (1, H)     f32
    # wo_ref  : (H, C)     bf16   out_layer weight, pre-transposed to [in, out]
    # bo_ref  : (1, C)     f32
    # val_ref : (BB, T)    f32
    # attn_ref: (BB, D, T) f32
    BB, D, H = src_ref.shape
    T = tgt_ref.shape[1]
    C = wo_ref.shape[1]

    # Flatten the batch block so both matmuls see BB*D rows (fills the MXU).
    x = src_ref[...].reshape(BB * D, H)                              # bf16

    # mapping: h = x @ Wm^T + bm   (bf16 operands, f32 accumulate)
    h = jnp.dot(x, wm_ref[...], preferred_element_type=jnp.float32) + bm_ref[...]

    # out_layer: logits = h @ Wo^T + bo
    logits = jnp.dot(h.astype(jnp.bfloat16), wo_ref[...],
                     preferred_element_type=jnp.float32) + bo_ref[...]   # (BB*D, C) f32

    # log-sum-exp over classes (stable, f32).
    m = jnp.max(logits, axis=-1, keepdims=True)                      # (BB*D, 1)
    lse = jnp.log(jnp.sum(jnp.exp(logits - m), axis=-1, keepdims=True)) + m

    # Gather logits at target ids via a per-batch one-hot matmul, then subtract
    # lse (identical to gathering log_softmax since one-hot columns sum to 1).
    logits3 = logits.reshape(BB, D, C)
    lse3 = lse.reshape(BB, D, 1)
    tgt = tgt_ref[...]                                               # (BB, T) i32
    classes = jax.lax.broadcasted_iota(jnp.int32, (BB, C, T), 1)     # (BB, C, T)
    onehot = (classes == tgt[:, None, :]).astype(jnp.float32)        # (BB, C, T)
    gathered = jnp.einsum('bdc,bct->bdt', logits3, onehot,
                          preferred_element_type=jnp.float32)        # (BB, D, T)
    logp_mat = gathered - lse3                                       # (BB, D, T)

    # val = max over source positions (torch dim=1); attn = softmax over same.
    maxd = jnp.max(logp_mat, axis=1, keepdims=True)                  # (BB, 1, T)
    e = jnp.exp(logp_mat - maxd)                                     # (BB, D, T)
    denom = jnp.sum(e, axis=1, keepdims=True)                        # (BB, 1, T)
    attn = e * pl.reciprocal(denom, approx=True)

    val_ref[...] = maxd[:, 0, :]
    attn_ref[...] = attn


def _choose_block_batch(B, D):
    """Pick BB so BB*D ~ 256 rows (v6e/v7x MXU; >=128 for v5e), BB | B, and
    prefer an even number of grid steps when possible (v7x has 2 TensorCores)."""
    target_rows = 256
    bb = min(B, max(1, target_rows // max(D, 1)))
    while B % bb:
        bb -= 1
    if (B // bb) % 2 == 1 and bb % 2 == 0 and (bb // 2) * D >= 128 and B % (bb // 2) == 0:
        bb //= 2
    return bb


def alignment_forward(source, target, params):
    """source: (B, D) int32, target: (B, T) int32 -> (val (B,T), attn (B,D,T))."""
    B, D = source.shape
    _, T = target.shape
    emb = params["embed"]          # (C, H)
    C, H = emb.shape

    BB = _choose_block_batch(B, D)
    grid = (B // BB,)

    # Embedding lookup is index glue; keep in plain JAX. Cast MXU operands bf16.
    src_embed = emb[source].astype(jnp.bfloat16)                     # (B, D, H)
    wm_t = params["mapping_w"].T.astype(jnp.bfloat16)                # (H, H)  [in, out]
    wo_t = params["out_w"].T.astype(jnp.bfloat16)                    # (H, C)  [in, out]
    bm = params["mapping_b"].reshape(1, H).astype(jnp.float32)
    bo = params["out_b"].reshape(1, C).astype(jnp.float32)

    # Explicit VMEM sizing (conservative, lane-padded to 128) so v7x's 64 MiB
    # doesn't silently spill; clamp to [32 MiB, 64 MiB].
    def _lp(n):  # pad a trailing dim to full 128 lanes
        return -(-n // 128) * 128
    rows = BB * D
    vmem_est = (
        2 * BB * D * _lp(H) * 2            # src block, bf16, double-buffered
        + 2 * BB * _lp(T) * 4              # target block, i32, double-buffered
        + (H * _lp(H) + H * _lp(C)) * 2    # weights, bf16, single-buffered
        + (_lp(H) + _lp(C)) * 4            # biases, f32
        + 2 * BB * _lp(T) * 4              # val out blocks
        + 2 * BB * D * _lp(T) * 4          # attn out blocks
        + 3 * rows * _lp(C) * 4            # logits / exp / logp intermediates
        + BB * C * _lp(T) * 4              # one-hot
    )
    vmem_limit = int(min(max(2 * vmem_est, 32 * 1024 * 1024), 64 * 1024 * 1024))

    val, attn = pl.pallas_call(
        _alignment_kernel,
        out_shape=(
            jax.ShapeDtypeStruct((B, T), jnp.float32),
            jax.ShapeDtypeStruct((B, D, T), jnp.float32),
        ),
        grid_spec=pltpu.PrefetchScalarGridSpec(
            num_scalar_prefetch=0,
            grid=grid,
            in_specs=[
                pl.BlockSpec((BB, D, H), lambda b: (b, 0, 0)),       # src_embed
                pl.BlockSpec((BB, T), lambda b: (b, 0)),             # target tokens
                # Grid-invariant weights/biases: single-buffered to save VMEM.
                pl.BlockSpec((H, H), lambda b: (0, 0), pipeline_mode=pl.Buffered(1)),
                pl.BlockSpec((1, H), lambda b: (0, 0), pipeline_mode=pl.Buffered(1)),
                pl.BlockSpec((H, C), lambda b: (0, 0), pipeline_mode=pl.Buffered(1)),
                pl.BlockSpec((1, C), lambda b: (0, 0), pipeline_mode=pl.Buffered(1)),
            ],
            out_specs=[
                pl.BlockSpec((BB, T), lambda b: (b, 0)),             # val
                pl.BlockSpec((BB, D, T), lambda b: (b, 0, 0)),       # attn
            ],
        ),
        compiler_params=pltpu.CompilerParams(
            dimension_semantics=("parallel",),
            vmem_limit_bytes=vmem_limit,
        ),
    )(src_embed, target.astype(jnp.int32), wm_t, bm, wo_t, bo)
    return val, attn


def reference_forward(source, target, params):
    emb = params["embed"]
    src_embed = emb[source]                                          # (B, D, H)
    h = src_embed @ params["mapping_w"].T + params["mapping_b"]      # (B, D, H)
    logits = h @ params["out_w"].T + params["out_b"]                 # (B, D, C)
    logp = jax.nn.log_softmax(logits, axis=-1)                       # (B, D, C)
    B, D, _ = logp.shape
    T = target.shape[1]
    idx = jnp.broadcast_to(target[:, None, :], (B, D, T))
    logp_mat = jnp.take_along_axis(logp, idx, axis=-1)               # (B, D, T)
    val = jnp.max(logp_mat, axis=1)                                  # (B, T)
    attn = jax.nn.softmax(logp_mat, axis=1)                          # (B, D, T)
    return val, attn


def init_params(key, n_class, n_hidden):
    k = jax.random.split(key, 5)
    scale = 0.02
    return {
        "embed": scale * jax.random.normal(k[0], (n_class, n_hidden), jnp.float32),
        "mapping_w": scale * jax.random.normal(k[1], (n_hidden, n_hidden), jnp.float32),
        "mapping_b": scale * jax.random.normal(k[2], (n_hidden,), jnp.float32),
        "out_w": scale * jax.random.normal(k[3], (n_class, n_hidden), jnp.float32),
        "out_b": scale * jax.random.normal(k[4], (n_class,), jnp.float32),
    }


if __name__ == "__main__":
    # Small shapes: batch=2, source length D=8, target length T=8,
    # embed_dim (n_hidden)=32, graph_dim (n_class)=64.
    B, D, T, H, C = 2, 8, 8, 32, 64

    key = jax.random.PRNGKey(0)
    kp, ks, kt = jax.random.split(key, 3)
    params = init_params(kp, n_class=C, n_hidden=H)
    source = jax.random.randint(ks, (B, D), 0, C, dtype=jnp.int32)
    target = jax.random.randint(kt, (B, T), 0, C, dtype=jnp.int32)

    val, attn = alignment_forward(source, target, params)
    jax.block_until_ready((val, attn))

    val_ref, attn_ref = reference_forward(source, target, params)
    # bf16 matmul operands + approx reciprocal => loosen tolerance vs f32 ref.
    np.testing.assert_allclose(np.asarray(val), np.asarray(val_ref), rtol=2e-2, atol=2e-3)
    np.testing.assert_allclose(np.asarray(attn), np.asarray(attn_ref), rtol=2e-2, atol=2e-3)

    print("KERNEL_OK")
</pallas_src>

<mosaic_0001>
module attributes {stable_mosaic.version = 11 : i64} {
  func.func @_alignment_kernel(%arg0: i32, %arg1: memref<2x8x32xbf16, #tpu.memory_space<vmem>>, %arg2: memref<2x8xi32, #tpu.memory_space<vmem>>, %arg3: memref<32x32xbf16, #tpu.memory_space<vmem>>, %arg4: memref<1x32xf32, #tpu.memory_space<vmem>>, %arg5: memref<32x64xbf16, #tpu.memory_space<vmem>>, %arg6: memref<1x64xf32, #tpu.memory_space<vmem>>, %arg7: memref<2x8xf32, #tpu.memory_space<vmem>>, %arg8: memref<2x8x8xf32, #tpu.memory_space<vmem>>) attributes {dimension_semantics = [#tpu.dimension_semantics<parallel>], iteration_bounds = array<i64: 1>, scalar_prefetch = 0 : i64, scratch_operands = 0 : i64, tpu.core_type = #tpu.core_type<tc>, window_params = [{transform_indices = @transform_0, window_bounds = array<i64: 2, 8, 32>}, {transform_indices = @transform_1, window_bounds = array<i64: 2, 8>}, {pipeline_mode = #tpu.pipeline_mode<synchronous>, transform_indices = @transform_2, window_bounds = array<i64: 32, 32>}, {pipeline_mode = #tpu.pipeline_mode<synchronous>, transform_indices = @transform_3, window_bounds = array<i64: 1, 32>}, {pipeline_mode = #tpu.pipeline_mode<synchronous>, transform_indices = @transform_4, window_bounds = array<i64: 32, 64>}, {pipeline_mode = #tpu.pipeline_mode<synchronous>, transform_indices = @transform_5, window_bounds = array<i64: 1, 64>}, {transform_indices = @transform_6, window_bounds = array<i64: 2, 8>}, {transform_indices = @transform_7, window_bounds = array<i64: 2, 8, 8>}]} {
    %c0 = arith.constant 0 : index
    %c0_0 = arith.constant 0 : index
    %c0_1 = arith.constant 0 : index
    %0 = vector.load %arg1[%c0, %c0_0, %c0_1] : memref<2x8x32xbf16, #tpu.memory_space<vmem>>, vector<2x8x32xbf16>
    %1 = vector.shape_cast %0 : vector<2x8x32xbf16> to vector<16x32xbf16>
    %c0_2 = arith.constant 0 : index
    %c0_3 = arith.constant 0 : index
    %2 = vector.load %arg3[%c0_2, %c0_3] : memref<32x32xbf16, #tpu.memory_space<vmem>>, vector<32x32xbf16>
    %cst = arith.constant dense<0.000000e+00> : vector<16x32xf32>
    %3 = tpu.matmul %1, %2, %cst {dimension_numbers = #tpu.dot_dimension_numbers<[1], [0], [0], [1], [0, 0, 1, 1], [], []>} : vector<16x32xbf16>, vector<32x32xbf16>, vector<16x32xf32> -> vector<16x32xf32>
    %c0_4 = arith.constant 0 : index
    %c0_5 = arith.constant 0 : index
    %4 = vector.load %arg4[%c0_4, %c0_5] : memref<1x32xf32, #tpu.memory_space<vmem>>, vector<1x32xf32>
    %5 = vector.broadcast %4 : vector<1x32xf32> to vector<16x32xf32>
    %6 = arith.addf %3, %5 : vector<16x32xf32>
    %7 = arith.truncf %6 : vector<16x32xf32> to vector<16x32xbf16>
    %c0_6 = arith.constant 0 : index
    %c0_7 = arith.constant 0 : index
    %8 = vector.load %arg5[%c0_6, %c0_7] : memref<32x64xbf16, #tpu.memory_space<vmem>>, vector<32x64xbf16>
    %cst_8 = arith.constant dense<0.000000e+00> : vector<16x64xf32>
    %9 = tpu.matmul %7, %8, %cst_8 {dimension_numbers = #tpu.dot_dimension_numbers<[1], [0], [0], [1], [0, 0, 1, 1], [], []>} : vector<16x32xbf16>, vector<32x64xbf16>, vector<16x64xf32> -> vector<16x64xf32>
    %c0_9 = arith.constant 0 : index
    %c0_10 = arith.constant 0 : index
    %10 = vector.load %arg6[%c0_9, %c0_10] : memref<1x64xf32, #tpu.memory_space<vmem>>, vector<1x64xf32>
    %11 = vector.broadcast %10 : vector<1x64xf32> to vector<16x64xf32>
    %12 = arith.addf %9, %11 : vector<16x64xf32>
    %cst_11 = arith.constant dense<0xFF800000> : vector<16xf32>
    %13 = vector.multi_reduction <maximumf>, %12, %cst_11 [1] : vector<16x64xf32> to vector<16xf32>
    %14 = vector.shape_cast %13 : vector<16xf32> to vector<16x1xf32>
    %15 = vector.broadcast %14 : vector<16x1xf32> to vector<16x64xf32>
    %16 = arith.subf %12, %15 : vector<16x64xf32>
    %17 = math.exp %16 : vector<16x64xf32>
    %cst_12 = arith.constant dense<0.000000e+00> : vector<16xf32>
    %18 = vector.multi_reduction <add>, %17, %cst_12 [1] : vector<16x64xf32> to vector<16xf32>
    %19 = vector.shape_cast %18 : vector<16xf32> to vector<16x1xf32>
    %20 = math.log %19 : vector<16x1xf32>
    %21 = arith.addf %20, %14 : vector<16x1xf32>
    %22 = vector.shape_cast %12 : vector<16x64xf32> to vector<2x8x64xf32>
    %23 = vector.shape_cast %21 : vector<16x1xf32> to vector<2x8x1xf32>
    %c0_13 = arith.constant 0 : index
    %c0_14 = arith.constant 0 : index
    %24 = vector.load %arg2[%c0_13, %c0_14] : memref<2x8xi32, #tpu.memory_space<vmem>>, vector<2x8xi32>
    %25 = tpu.iota {dimensions = array<i32: 1>} : vector<2x64x8xi32>
    %26 = vector.shape_cast %24 : vector<2x8xi32> to vector<2x1x8xi32>
    %27 = vector.broadcast %26 : vector<2x1x8xi32> to vector<2x64x8xi32>
    %28 = arith.cmpi eq, %25, %27 : vector<2x64x8xi32>
    %29 = arith.extui %28 : vector<2x64x8xi1> to vector<2x64x8xi32>
    %30 = arith.sitofp %29 : vector<2x64x8xi32> to vector<2x64x8xf32>
    "tpu.trace_start"() <{level = 10 : i32, message = "bdc,bct->bdt"}> : () -> ()
    %cst_15 = arith.constant dense<0.000000e+00> : vector<2x8x8xf32>
    %31 = tpu.matmul %22, %30, %cst_15 {dimension_numbers = #tpu.dot_dimension_numbers<[2], [1], [1], [2], [0, 0, 0, 1, 1, 2], [0], [0]>} : vector<2x8x64xf32>, vector<2x64x8xf32>, vector<2x8x8xf32> -> vector<2x8x8xf32>
    "tpu.trace_stop"() : () -> ()
    %32 = vector.broadcast %23 : vector<2x8x1xf32> to vector<2x8x8xf32>
    %33 = arith.subf %31, %32 : vector<2x8x8xf32>
    %cst_16 = arith.constant dense<0xFF800000> : vector<2x8xf32>
    %34 = vector.multi_reduction <maximumf>, %33, %cst_16 [1] : vector<2x8x8xf32> to vector<2x8xf32>
    %35 = vector.shape_cast %34 : vector<2x8xf32> to vector<2x1x8xf32>
    %36 = vector.broadcast %35 : vector<2x1x8xf32> to vector<2x8x8xf32>
    %37 = arith.subf %33, %36 : vector<2x8x8xf32>
    %38 = math.exp %37 : vector<2x8x8xf32>
    %cst_17 = arith.constant dense<0.000000e+00> : vector<2x8xf32>
    %39 = vector.multi_reduction <add>, %38, %cst_17 [1] : vector<2x8x8xf32> to vector<2x8xf32>
    %40 = vector.shape_cast %39 : vector<2x8xf32> to vector<2x1x8xf32>
    %41 = tpu.reciprocal %40 {approx = true} : vector<2x1x8xf32> -> vector<2x1x8xf32>
    %42 = vector.broadcast %41 : vector<2x1x8xf32> to vector<2x8x8xf32>
    %43 = arith.mulf %38, %42 : vector<2x8x8xf32>
    %44 = vector.shape_cast %35 : vector<2x1x8xf32> to vector<2x8xf32>
    %c0_18 = arith.constant 0 : index
    %c0_19 = arith.constant 0 : index
    %45 = vector.load %arg7[%c0_18, %c0_19] : memref<2x8xf32, #tpu.memory_space<vmem>>, vector<2x8xf32>
    tpu.vector_store %arg7[%c0_18, %c0_19], %44 {strides = array<i32>} : memref<2x8xf32, #tpu.memory_space<vmem>>, vector<2x8xf32>,
    %c0_20 = arith.constant 0 : index
    %c0_21 = arith.constant 0 : index
    %c0_22 = arith.constant 0 : index
    %46 = vector.load %arg8[%c0_20, %c0_21, %c0_22] : memref<2x8x8xf32, #tpu.memory_space<vmem>>, vector<2x8x8xf32>
    tpu.vector_store %arg8[%c0_20, %c0_21, %c0_22], %43 {strides = array<i32>} : memref<2x8x8xf32, #tpu.memory_space<vmem>>, vector<2x8x8xf32>,
    return
  }
  func.func @transform_0(%arg0: i32) -> (i32, i32, i32) {
    %c0_i32 = arith.constant 0 : i32
    %c0_i32_0 = arith.constant 0 : i32
    %c0_i32_1 = arith.constant 0 : i32
    return %arg0, %c0_i32, %c0_i32_0 : i32, i32, i32
  }
  func.func @transform_1(%arg0: i32) -> (i32, i32) {
    %c0_i32 = arith.constant 0 : i32
    %c0_i32_0 = arith.constant 0 : i32
    return %arg0, %c0_i32 : i32, i32
  }
  func.func @transform_2(%arg0: i32) -> (i32, i32) {
    %c0_i32 = arith.constant 0 : i32
    %c0_i32_0 = arith.constant 0 : i32
    %c0_i32_1 = arith.constant 0 : i32
    return %c0_i32, %c0_i32_0 : i32, i32
  }
  func.func @transform_3(%arg0: i32) -> (i32, i32) {
    %c0_i32 = arith.constant 0 : i32
    %c0_i32_0 = arith.constant 0 : i32
    %c0_i32_1 = arith.constant 0 : i32
    return %c0_i32, %c0_i32_0 : i32, i32
  }
  func.func @transform_4(%arg0: i32) -> (i32, i32) {
    %c0_i32 = arith.constant 0 : i32
    %c0_i32_0 = arith.constant 0 : i32
    %c0_i32_1 = arith.constant 0 : i32
    return %c0_i32, %c0_i32_0 : i32, i32
  }
  func.func @transform_5(%arg0: i32) -> (i32, i32) {
    %c0_i32 = arith.constant 0 : i32
    %c0_i32_0 = arith.constant 0 : i32
    %c0_i32_1 = arith.constant 0 : i32
    return %c0_i32, %c0_i32_0 : i32, i32
  }
  func.func @transform_6(%arg0: i32) -> (i32, i32) {
    %c0_i32 = arith.constant 0 : i32
    %c0_i32_0 = arith.constant 0 : i32
    return %arg0, %c0_i32 : i32, i32
  }
  func.func @transform_7(%arg0: i32) -> (i32, i32, i32) {
    %c0_i32 = arith.constant 0 : i32
    %c0_i32_0 = arith.constant 0 : i32
    %c0_i32_1 = arith.constant 0 : i32
    return %arg0, %c0_i32, %c0_i32_0 : i32, i32, i32
  }
}

</mosaic_0001>

<bundles_post_ra>
// kernel: tpu_custom_call.1
= control target key start
LH: loop header
LB: loop body
LE: loop exit
PB: predicated region body
PF: predicated region fallthrough
CT: control target
= control target key end

     0   :  { %13 = vsyncpa [#allocation3], 0  ;;  %s1029_s0 = inlined_call_operand.hbm [shape: bf16[2,8,32], index: 0, kind: input, shape index: {}]   ;;  %s1030_s1 = inlined_call_operand.vmem [shape: s32[2,8], index: 1, kind: input, shape index: {}]   ;;  %s1031_s2 = inlined_call_operand.hbm [shape: bf16[32,32], index: 2, kind: input, shape index: {}]   ;;  %s1032_s3 = inlined_call_operand.vmem [shape: f32[1,32], index: 3, kind: input, shape index: {}]   ;;  %s1033_s4 = inlined_call_operand.hbm [shape: bf16[32,64], index: 4, kind: input, shape index: {}]   ;;  %s1034_s5 = inlined_call_operand.vmem [shape: f32[1,64], index: 5, kind: input, shape index: {}]   ;;  %s1035_s6 = inlined_call_operand.hbm [shape: f32[2,8], index: 6, kind: output, shape index: {0}]   ;;  %s1036_s7 = inlined_call_operand.hbm [shape: f32[2,8,8], index: 7, kind: output, shape index: {1}]  }
   0x1   :  { %14 = vsyncpa [#allocation6], 0 }
   0x2   :  { %15 = vsyncpa [#allocation4], 0 }
   0x3   :  { %16 = vsyncpa [#allocation10], 0  ;;  %s852_s24 = smov [#allocation5]   ;;  %s853_s26 = smov [#allocation2]  }
   0x4   :  { %s36_s25 = sshll.u32 %s852_s24, 4  ;;  %s22_s27 = sshll.u32 %s853_s26, 4  ;;  %s37_s25 = int_to_ptr.vmem [resolvable:$true] %s36_s25  ;;  %s906_s27 = int_to_ptr.vmem [resolvable:$true] %s22_s27 }
   0x5   :  { %s734_s30 = scalar_lea.hbm %s1031_s2, 256 }
   0x6   :  { %p735_p0 = scmp.ne.s32.totalorder %s1031_s2, %s734_s30  ;;  %p738_p1 = scmp.lt.u32.totalorder %s734_s30, %s1031_s2 }
   0x8   :  { %p740_p2 = pnand %p738_p1, %p735_p0 }
   0xa   :  { %743 = shalt.err (!%p740_p2)
}
   0xb   :  { %s744_s12 = scalar_lea.vmem %s37_s25, 256  ;;  %p749_p4 = scmp.lt.s32.totalorder %s37_s25, %s37_s25 }
   0xc   :  { %p745_p3 = scmp.ne.s32.totalorder %s37_s25, %s744_s12  ;;  %p750_p5 = scmp.lt.s32.totalorder %s744_s12, %s744_s12 }
   0xe   :  { %p751_p6 = por %p750_p5, %p749_p4 }
  0x10   :  { %p752_p7 = pnand %p751_p6, %p745_p3 }
  0x12   :  { %755 = shalt.err (!%p752_p7)
}
  0x13   :  { %s854_s13 = smov 64   ;;  %s855_s14 = smov 4  }
  0x14   :  { %42 = dma.hbm_to_vmem [thread:$0]  %s1031_s2, 256, %s37_s25, [#allocation6], %s854_s13, %s854_s13, %s855_s14  }
  0x15   :  { %s756_s19 = scalar_lea.hbm %s1029_s0, 128 }
  0x16   :  { %p757_p8 = scmp.ne.s32.totalorder %s1029_s0, %s756_s19  ;;  %p760_p9 = scmp.lt.u32.totalorder %s756_s19, %s1029_s0 }
  0x18   :  { %p762_p10 = pnand %p760_p9, %p757_p8 }
  0x1a   :  { %765 = shalt.err (!%p762_p10)
}
  0x1b   :  { %s766_s24 = scalar_lea.vmem %s906_s27, 128  ;;  %p771_p12 = scmp.lt.s32.totalorder %s906_s27, %s906_s27 }
  0x1c   :  { %p767_p11 = scmp.ne.s32.totalorder %s906_s27, %s766_s24  ;;  %p772_p13 = scmp.lt.s32.totalorder %s766_s24, %s766_s24 }
  0x1e   :  { %p773_p0 = por %p772_p13, %p771_p12 }
  0x20   :  { %p774_p1 = pnand %p773_p0, %p767_p11 }
  0x22   :  { %777 = shalt.err (!%p774_p1)
}
  0x23   :  { %28 = dma.hbm_to_vmem [thread:$0]  %s1029_s0, 128, %s906_s27, [#allocation3], %s854_s13, %s854_s13, %s855_s14  }
  0x24   :  { %s856_s26 = smov [#allocation7]   ;;  %s778_s8 = scalar_lea.hbm %s1033_s4, 256 }
  0x25   :  { %s50_s28 = sshll.u32 %s856_s26, 4  ;;  %p779_p2 = scmp.ne.s32.totalorder %s1033_s4, %s778_s8  ;;  %s51_s28 = int_to_ptr.vmem [resolvable:$true] %s50_s28 }
  0x26   :  { %p782_p3 = scmp.lt.u32.totalorder %s778_s8, %s1033_s4 }
  0x28   :  { %p784_p4 = pnand %p782_p3, %p779_p2 }
  0x2a   :  { %787 = shalt.err (!%p784_p4)
}
  0x2b   :  { %s788_s15 = scalar_lea.vmem %s51_s28, 256  ;;  %p793_p6 = scmp.lt.s32.totalorder %s51_s28, %s51_s28 }
  0x2c   :  { %p789_p5 = scmp.ne.s32.totalorder %s51_s28, %s788_s15  ;;  %p794_p7 = scmp.lt.s32.totalorder %s788_s15, %s788_s15 }
  0x2e   :  { %p795_p8 = por %p794_p7, %p793_p6 }
  0x30   :  { %p796_p9 = pnand %p795_p8, %p789_p5 }
  0x32   :  { %799 = shalt.err (!%p796_p9)
}
  0x33   :  { %56 = dma.hbm_to_vmem [thread:$0]  %s1033_s4, 256, %s51_s28, [#allocation6], %s854_s13, %s854_s13, %s855_s14  }
  0x34   :  { %844 = dma.done.wait [#allocation3], 128  }
  0x35   :  { %845 = vsyncadd [#allocation3], 4294967168 }
  0x36   :  { %846 = dma.done.wait [#allocation6], 512  }
  0x37   :  { %847 = vsyncadd [#allocation6], 4294966784  ;;  %v857_v0 = vmov 0.0   ;;  %vm858_vm0 = vmmov 0   ;;  %v713_v1 = vld [vmem:[#allocation5] sm:$0xff]   ;;  %v714_v2 = vld [vmem:[#allocation5 + $0x8] sm:$0xff]   ;;  %v238_v6 = vlaneseq }
  0x38   :  { %621 = vmatprep.subr.bf16.mxu0 %v857_v0  ;;  %625 = vmatprep.mubr.msk.bf16.mxu0 %vm858_vm0, %v857_v0  ;;  %v715_v3 = vld [vmem:[#allocation2] sm:$0xff]   ;;  %vm99_vm1 = vcmask 261120   ;;  %v716_v4 = vld [vmem:[#allocation7] sm:$0xff]   ;;  %v859_v7 = vmov 0.0|0.0   ;;  %v860_v10 = vmov 1966171168  }
  0x39   :  { %629 = vmatprep.subr.bf16.mxu1 %v857_v0  ;;  %633 = vmatprep.mubr.msk.bf16.mxu1 %vm858_vm0, %v857_v0  ;;  %v717_v5 = vld [vmem:[#allocation7 + $0x8] sm:$0xff]   ;;  %v239_v9 = vshrl.u32 %v238_v6, 7  ;;  %v256_v11 = vunpack.c.l.s4 %v860_v10  ;;  %v861_v25 = vmov 1.0|1.0  }
  0x3a   :  { %622 = vmatpush3.bf16.msra.mxu0 %v713_v1  ;;  %630 = vmatpush3.bf16.msra.mxu1 %v716_v4  ;;  %v562_v8 = vld.sshfl [vmem:[%s1030_s1] sm:$0x11 pattern:$0x75316420] }
  0x3b   :  { %623 = vmatprep.subr.bf16.mxu0 %v857_v0  ;;  %631 = vmatprep.subr.bf16.mxu1 %v857_v0  ;;  %v257_v12 = vunpack.c.0.s8 %v256_v11  ;;  %v254_v13 = vcombine.high %v562_v8, %v562_v8  ;;  %v271_v15 = vsub.s32 0, %v239_v9  ;;  %v240_v16 = vadd.s32 8, %v239_v9  ;;  %v553_v28 = vld [vmem:[%s1032_s3] ss:$0 sm:$0xff] }
  0x3c   :  { %v241_v19 = vadd.s32 16, %v239_v9  ;;  %v242_v20 = vadd.s32 24, %v239_v9  ;;  %v243_v23 = vadd.s32 32, %v239_v9  ;;  %v244_v24 = vadd.s32 40, %v239_v9  ;;  %v558_v38 = vld [vmem:[%s1034_s5] ss:$0 sm:$0xff] }
  0x3d   :  { %v260_v14 = vsub.s32 %v257_v12, %v239_v9  ;;  %v245_v36 = vadd.s32 48, %v239_v9  ;;  %v246_v37 = vadd.s32 56, %v239_v9  ;;  %s862_s5 = smov [#allocation8]  }
  0x3e   :  { %624 = vmatpush3.bf16.msra.mxu0 %v714_v2  ;;  %632 = vmatpush3.bf16.msra.mxu1 %v717_v5  ;;  %s527_s17 = sshll.u32 %s862_s5, 4  ;;  %s528_s17 = int_to_ptr.vmem [resolvable:$true] %s527_s17 }
  0x3f   :  { %675 = vmatprep.subr.bf16.mxu0 %v859_v7  ;;  %687 = vmatprep.subr.bf16.mxu1 %v859_v7  ;;  %v261_v17 = vrot.slane %v562_v8, %v260_v14  ;;  %v268_v18 = vrot.slane %v254_v13, %v260_v14  ;;  %s800_s18 = scalar_lea.vmem %s528_s17, 32  ;;  %p805_p11 = scmp.lt.s32.totalorder %s528_s17, %s528_s17 }
  0x40   :  { %p801_p10 = scmp.ne.s32.totalorder %s528_s17, %s800_s18  ;;  %p806_p12 = scmp.lt.s32.totalorder %s800_s18, %s800_s18 }
  0x41   :  { %626 = vmatmul.mubr.msk.bf16.vlgmr.msra.gmra.mrb[0].mxu0 %vm99_vm1, %v715_v3  ;;  %v272_v21 = vrot.slane %v261_v17, %v271_v15  ;;  %v276_v22 = vrot.slane %v268_v18, %v271_v15 }
  0x42   :  { %653 = vmatprep.mubr.msk.f32.mxu0 %vm858_vm0, %v857_v0  ;;  %p807_p13 = por %p806_p12, %p805_p11 }
  0x43   :  { %vm277_vm2 = vcmp.eq.s32.totalorder %v239_v9, %v272_v21  ;;  %vm278_vm3 = vcmp.eq.s32.totalorder %v240_v16, %v272_v21  ;;  %vm279_vm5 = vcmp.eq.s32.totalorder %v241_v19, %v272_v21  ;;  %vm280_vm6 = vcmp.eq.s32.totalorder %v242_v20, %v272_v21 }
  0x44   :  { %vm676_vm4 = vmpackc.low %vm278_vm3, %vm277_vm2  ;;  %vm287_vm7 = vcmp.eq.s32.totalorder %v241_v19, %v276_v22  ;;  %vm288_vm8 = vcmp.eq.s32.totalorder %v242_v20, %v276_v22  ;;  %vm289_vm10 = vcmp.eq.s32.totalorder %v243_v23, %v276_v22  ;;  %vm290_vm11 = vcmp.eq.s32.totalorder %v244_v24, %v276_v22  ;;  %p808_p0 = pnand %p807_p13, %p801_p10 }
  0x45   :  { %677 = vmatpush3.bf16.msk.msra.mxu0 %vm676_vm4, %v861_v25  ;;  %vm679_vm9 = vmpackc.low %vm280_vm6, %vm279_vm5  ;;  %vm281_vm13 = vcmp.eq.s32.totalorder %v243_v23, %v272_v21  ;;  %vm282_vm14 = vcmp.eq.s32.totalorder %v244_v24, %v272_v21  ;;  %vm285_vm3 = vcmp.eq.s32.totalorder %v239_v9, %v276_v22  ;;  %vm286_vm4 = vcmp.eq.s32.totalorder %v240_v16, %v276_v22 }
  0x46   :  { %678 = vmatprep.subr.bf16.mxu0 %v859_v7  ;;  %vm972_vm12 = vmpackc.low %vm288_vm8, %vm287_vm7  ;;  %vm283_vm6 = vcmp.eq.s32.totalorder %v245_v36, %v272_v21  ;;  %vm284_vm7 = vcmp.eq.s32.totalorder %v246_v37, %v272_v21 }
  0x47   :  { %vm976_vm15 = vmpackc.low %vm290_vm11, %vm289_vm10  ;;  %vm473_vm11 = vcmask 64512  }
  0x48   :  { %vm682_vm2 = vmpackc.low %vm282_vm14, %vm281_vm13  ;;  %vm517_vm13 = vcmask 58368  }
  0x49   :  { %680 = vmatpush3.bf16.msk.msra.mxu0 %vm679_vm9, %v861_v25  ;;  %vm688_vm5 = vmpackc.low %vm286_vm4, %vm285_vm3  ;;  %vm292_vm9 = vcmp.eq.s32.totalorder %v246_v37, %v276_v22 }
  0x4a   :  { %681 = vmatprep.subr.bf16.mxu0 %v859_v7  ;;  %vm685_vm8 = vmpackc.low %vm284_vm7, %vm283_vm6 }
  0x4d   :  { %683 = vmatpush3.bf16.msk.msra.mxu0 %vm682_vm2, %v861_v25 }
  0x4e   :  { %684 = vmatprep.subr.bf16.mxu0 %v859_v7 }
  0x51   :  { %686 = vmatpush3.bf16.msk.msra.mxu0 %vm685_vm8, %v861_v25 }
 0x114   :  { %v137_v29 = vpop.f32.mrb[0].mxu0 }
 0x115   :  { %v627_v30 = vpop.f32.mrb[1].mxu0  ;;  %v138_v32 = vadd.f32 %v553_v28, %v137_v29 }
 0x116   :  { %v140_v31 = vpop.f32.mrb[2].mxu0 }
 0x117   :  { %v141_v33 = vadd.f32 %v553_v28, %v140_v31  ;;  %v628_v34 = vpop.f32.mrb[3].mxu0 }
 0x119   :  { %v144_v35 = vpack.c.bf16 %v141_v33, %v138_v32 }
 0x11b   :  { %634 = vmatmul.mubr.msk.bf16.vlgmr.msra.gmra.mrb[0].mxu1 %vm99_vm1, %v144_v35  ;;  %vm291_vm1 = vcmp.eq.s32.totalorder %v245_v36, %v276_v22 }
 0x11c   :  { %689 = vmatpush3.bf16.msk.msra.mxu1 %vm688_vm5, %v861_v25  ;;  %672 = vmatprep.mubr.msk.f32.mxu1 %vm858_vm0, %v857_v0  ;;  %vm697_vm10 = vmpackc.low %vm292_vm9, %vm291_vm1  ;;  %vm212_vm0 = vcmask 523264  }
 0x11d   :  { %690 = vmatprep.subr.bf16.mxu1 %v859_v7 }
 0x120   :  { %692 = vmatpush3.bf16.msk.msra.mxu1 %vm972_vm12, %v861_v25  ;;  %vm514_vm12 = vcmask 1041409  }
 0x121   :  { %693 = vmatprep.subr.bf16.mxu1 %v859_v7 }
 0x124   :  { %695 = vmatpush3.bf16.msk.msra.mxu1 %vm976_vm15, %v861_v25 }
 0x125   :  { %696 = vmatprep.subr.bf16.mxu1 %v859_v7 }
 0x128   :  { %698 = vmatpush3.bf16.msk.msra.mxu1 %vm697_vm10, %v861_v25 }
 0x1ee   :  { %v205_v39 = vpop.f32.mrb[0].mxu1 }
 0x1ef   :  { %v206_v40 = vadd.f32 %v558_v38, %v205_v39  ;;  %v635_v41 = vpop.f32.mrb[1].mxu1 }
 0x1f0   :  { %v208_v42 = vpop.f32.mrb[2].mxu1 }
 0x1f1   :  { %v209_v43 = vadd.f32 %v558_v38, %v208_v42  ;;  %v636_v44 = vpop.f32.mrb[3].mxu1  ;;  %654 = vmatmul.mubr.msk.f32.vlgmr.msra.gmra.mrb[4].mxu0 %vm212_vm0, %v206_v40  ;;  %v213_v45 = vsel %vm212_vm0, %v206_v40, -inf }
 0x1f2   :  { %214 = vmax.xlane.f32.xlu0 %v213_v45 }
 0x1f3   :  { %673 = vmatmul.mubr.msk.f32.vlgmr.msra.gmra.mrb[4].mxu1 %vm212_vm0, %v209_v43  ;;  %v216_v46 = vsel %vm212_vm0, %v209_v43, -inf }
 0x1f6   :  { %217 = vmax.xlane.f32.xlu0 %v216_v46 }
 0x27f   :  { %v215_v47 = vpop.xlane.xlu0 %214 }
 0x280   :  { %v219_v48 = vsub.f32 %v206_v40, %v215_v47 }
 0x282   :  { %v221_v49 = vmul.f32 1.442695, %v219_v48 }
 0x283   :  { %v218_v50 = vpop.xlane.xlu0 %217 }
 0x284   :  { %718 = vpow2.f32 %v221_v49  ;;  %v220_v51 = vsub.f32 %v209_v43, %v218_v50 }
 0x286   :  { %v223_v52 = vmul.f32 1.442695, %v220_v51 }
 0x288   :  { %720 = vpow2.f32 %v223_v52 }
 0x28e   :  { %v719_v53 = vpop.eup %718 }
 0x28f   :  { %v225_v54 = vsel %vm212_vm0, %v719_v53, 0.0 }
 0x290   :  { %226 = vadd.xlane.f32.xlu1 %v225_v54 }
 0x292   :  { %v721_v55 = vpop.eup %720 }
 0x293   :  { %v228_v56 = vsel %vm212_vm0, %v721_v55, 0.0 }
 0x294   :  { %229 = vadd.xlane.f32.xlu1 %v228_v56 }
 0x2c4   :  { %v394_v57 = vpop.f32.mrb[4].mxu0 }
 0x2c5   :  { %v655_v58 = vpop.f32.mrb[5].mxu0 }
 0x2c6   :  { %v467_v59 = vpop.f32.mrb[4].mxu1 }
 0x2c7   :  { %v674_v60 = vpop.f32.mrb[5].mxu1 }
 0x31d   :  { %v227_v61 = vpop.xlane.xlu1 %226 }
 0x31e   :  { %722 = vlog2.f32 %v227_v61 }
 0x321   :  { %v230_v62 = vpop.xlane.xlu1 %229 }
 0x322   :  { %724 = vlog2.f32 %v230_v62 }
 0x328   :  { %v723_v63 = vpop.eup %722 }
 0x329   :  { %v232_v0 = vmul.f32 0.6931472, %v723_v63 }
 0x32b   :  { %v235_v1 = vadd.f32 %v232_v0, %v215_v47 }
 0x32c   :  { %v725_v2 = vpop.eup %724 }
 0x32d   :  { %v471_v3 = vsub.f32 %v394_v57, %v235_v1  ;;  %v234_v4 = vmul.f32 0.6931472, %v725_v2 }
 0x32f   :  { %v474_v5 = vsel %vm473_vm11, %v471_v3, -inf  ;;  %v236_v6 = vadd.f32 %v234_v4, %v218_v50 }
 0x330   :  { %v475_v7 = vrot.slane %v474_v5, 4 }
 0x331   :  { %v472_v8 = vsub.f32 %v467_v59, %v236_v6 }
 0x332   :  { %v476_v9 = vmax.f32 %v474_v5, %v475_v7 }
 0x333   :  { %v481_v10 = vsel %vm473_vm11, %v472_v8, -inf }
 0x334   :  { %v477_v11 = vrot.slane %v476_v9, 2  ;;  %v482_v12 = vrot.slane %v481_v10, 4 }
 0x336   :  { %v483_v13 = vmax.f32 %v481_v10, %v482_v12  ;;  %v478_v14 = vmax.f32 %v476_v9, %v477_v11 }
 0x338   :  { %v484_v15 = vrot.slane %v483_v13, 2  ;;  %v479_v16 = vrot.slane %v478_v14, 1 }
 0x33a   :  { %v485_v17 = vmax.f32 %v483_v13, %v484_v15  ;;  %v480_v18 = vmax.f32 %v478_v14, %v479_v16 }
 0x33c   :  { %v486_v19 = vrot.slane %v485_v17, 1  ;;  %v488_v20 = vsub.f32 %v471_v3, %v480_v18 }
 0x33e   :  { %v487_v21 = vmax.f32 %v485_v17, %v486_v19  ;;  %v490_v22 = vmul.f32 1.442695, %v488_v20 }
 0x340   :  { %v489_v23 = vsub.f32 %v472_v8, %v487_v21  ;;  %726 = vpow2.f32 %v490_v22  ;;  %v515_v24 = vsel %vm514_vm12, %v487_v21, %v480_v18 }
 0x341   :  { %518 = vst.msk [vmem:[#allocation8] sm:$0x3] %vm517_vm13, %v515_v24 }
 0x342   :  { %v492_v25 = vmul.f32 1.442695, %v489_v23 }
 0x343   :  { %811 = shalt.err (!%p808_p0)
}
 0x344   :  { %s812_s21 = scalar_lea.hbm %s1035_s6, 32 }
 0x345   :  { %p813_p1 = scmp.ne.s32.totalorder %s1035_s6, %s812_s21  ;;  %p816_p2 = scmp.lt.u32.totalorder %s812_s21, %s1035_s6 }
 0x347   :  { %p818_p3 = pnand %p816_p2, %p813_p1 }
 0x349   :  { %821 = shalt.err (!%p818_p3)
}
 0x34a   :  { %530 = dma.vmem_to_hbm [thread:$0]  %s528_s17, 32, %s1035_s6, [#allocation4]   ;;  %728 = vpow2.f32 %v492_v25  ;;  %v727_v26 = vpop.eup %726 }
 0x34b   :  { %v494_v27 = vsel %vm473_vm11, %v727_v26, 0.0  ;;  %s863_s6 = smov [#allocation9]  }
 0x34c   :  { %v495_v28 = vrot.slane %v494_v27, 4  ;;  %s536_s28 = sshll.u32 %s863_s6, 4  ;;  %s537_s28 = int_to_ptr.vmem [resolvable:$true] %s536_s28 }
 0x34d   :  { %s822_s29 = scalar_lea.vmem %s537_s28, 256  ;;  %p827_p5 = scmp.lt.s32.totalorder %s537_s28, %s537_s28 }
 0x34e   :  { %v496_v30 = vadd.f32 %v495_v28, %v494_v27  ;;  %p823_p4 = scmp.ne.s32.totalorder %s537_s28, %s822_s29  ;;  %p828_p6 = scmp.lt.s32.totalorder %s822_s29, %s822_s29 }
 0x350   :  { %v497_v33 = vrot.slane %v496_v30, 2  ;;  %p829_p7 = por %p828_p6, %p827_p5 }
 0x352   :  { %v498_v35 = vadd.f32 %v497_v33, %v496_v30  ;;  %p830_p8 = pnand %p829_p7, %p823_p4 }
 0x354   :  { %v729_v29 = vpop.eup %728  ;;  %v499_v37 = vrot.slane %v498_v35, 1 }
 0x355   :  { %v501_v31 = vsel %vm473_vm11, %v729_v29, 0.0 }
 0x356   :  { %v502_v32 = vrot.slane %v501_v31, 4  ;;  %v500_v39 = vadd.f32 %v499_v37, %v498_v35 }
 0x358   :  { %v503_v34 = vadd.f32 %v502_v32, %v501_v31  ;;  %730 = vrcp.f32 %v500_v39 }
 0x35a   :  { %v504_v36 = vrot.slane %v503_v34, 2 }
 0x35c   :  { %v505_v38 = vadd.f32 %v504_v36, %v503_v34 }
 0x35e   :  { %v506_v40 = vrot.slane %v505_v38, 1 }
 0x360   :  { %v507_v41 = vadd.f32 %v506_v40, %v505_v38 }
 0x362   :  { %732 = vrcp.f32 %v507_v41  ;;  %v731_v42 = vpop.eup %730 }
 0x363   :  { %v510_v43 = vmul.f32 %v731_v42, %v727_v26 }
 0x365   :  { %519 = vst.msk [vmem:[#allocation9] sm:$0xff] %vm473_vm11, %v510_v43 }
 0x36c   :  { %v733_v44 = vpop.eup %732 }
 0x36d   :  { %v511_v45 = vmul.f32 %v733_v44, %v729_v29 }
 0x36f   :  { %520 = vst.msk [vmem:[#allocation9 + $0x8] sm:$0xff] %vm473_vm11, %v511_v45 }
 0x370   :  { %833 = shalt.err (!%p830_p8)
}
 0x371   :  { %s834_s9 = scalar_lea.hbm %s1036_s7, 256 }
 0x372   :  { %p835_p9 = scmp.ne.s32.totalorder %s1036_s7, %s834_s9  ;;  %p838_p10 = scmp.lt.u32.totalorder %s834_s9, %s1036_s7 }
 0x374   :  { %p840_p11 = pnand %p838_p10, %p835_p9 }
 0x376   :  { %843 = shalt.err (!%p840_p11)
}
 0x377   :  { %s864_s0 = smov 128   ;;  %s865_s27 = smov 8  }
 0x378   :  { %542 = dma.vmem_to_hbm [thread:$0]  %s537_s28, 256, %s1036_s7, [#allocation10], %s864_s0, %s864_s0, %s865_s27  }
 0x379   :  { %848 = dma.done.wait [#allocation4], 32  }
 0x37a   :  { %849 = vsyncadd [#allocation4], 4294967264 }
 0x37b   :  { %850 = dma.done.wait [#allocation10], 256  }
 0x37c   :  { %851 = vsyncadd [#allocation10], 4294967040 }
 0x37d   :  { %549 = vsyncpa [#allocation3], 1 }
 0x37e   :  { %550 = vsyncpa [#allocation6], 1 }
 0x37f   :  { %551 = vsyncpa [#allocation4], 1 }
 0x380   :  { %552 = vsyncpa [#allocation10], 1 }

</bundles_post_ra>
